<compile_context>
chip_gen: v7x
topology: tpu7x:2x2x1
jax: 0.10.0
libtpu: 0.0.40
codegen_flags: <defaults>
</compile_context>

<pallas_src>
import functools

import jax
import jax.numpy as jnp
from jax import lax
from jax.experimental import pallas as pl
from jax.experimental.pallas import tpu as pltpu

LANE = 128
SUBLANE = 8


def _round_up(x, m):
    return ((x + m - 1) // m) * m


def _make_kernel(n_actions):
    """PPO MLP forward with fused (policy | value | zero-pad) head, lane-dense output."""

    def kernel(x_ref, w1_ref, b1_ref, w2_ref, b2_ref, wh_ref, bh_ref, out_ref):
        x = x_ref[...]                                                     # [tile_b, in_dim]
        h1 = jnp.dot(x, w1_ref[...], preferred_element_type=jnp.float32) + b1_ref[...]
        h1 = jnp.maximum(h1, 0.0)                                          # ReLU
        h2 = jnp.dot(h1, w2_ref[...], preferred_element_type=jnp.float32) + b2_ref[...]
        h2 = jnp.maximum(h2, 0.0)                                          # ReLU
        # Fused head: columns [0, n_actions) = policy logits, column n_actions = value,
        # remaining columns are zero padding (zero weights & biases).
        fused = jnp.dot(h2, wh_ref[...], preferred_element_type=jnp.float32) + bh_ref[...]
        cols = lax.broadcasted_iota(jnp.int32, fused.shape, 1)
        is_action = cols < n_actions
        # Softmax over the action columns only (value/pad lanes masked to -inf so
        # they contribute nothing to the max or the denominator).
        logits = jnp.where(is_action, fused, -jnp.inf)
        m = jnp.max(logits, axis=-1, keepdims=True)
        e = jnp.exp(logits - m)
        probs = e / jnp.sum(e, axis=-1, keepdims=True)
        out_ref[...] = jnp.where(is_action, probs, fused)                  # policy | raw value | zeros

    return kernel


def init_ppo_params(key, in_dim, hidden, n_actions, dtype=jnp.float32):
    """Deterministic synthetic parameters (PyTorch Linear shapes: W=[out,in], b=[out])."""
    ks = jax.random.split(key, 8)
    scale = 0.1

    def lin(kw, kb, fan_in, fan_out):
        w = scale * jax.random.normal(kw, (fan_out, fan_in), dtype)        # PyTorch [out, in]
        b = scale * jax.random.normal(kb, (fan_out,), dtype)
        return w, b

    w1, b1 = lin(ks[0], ks[1], in_dim, hidden)
    w2, b2 = lin(ks[2], ks[3], hidden, hidden)
    wp, bp = lin(ks[4], ks[5], hidden, n_actions)
    wv, bv = lin(ks[6], ks[7], hidden, 1)
    return dict(w1=w1, b1=b1, w2=w2, b2=b2, wp=wp, bp=bp, wv=wv, bv=bv)


def prepare_adapt_params(params):
    """One-time layout pass: transpose weights to [in, out], fuse the policy and value
    heads into a single [hidden, 128]-padded matrix, and reshape biases to row vectors.
    The per-call wrapper then has zero transpose / reshape work."""
    w1 = jnp.asarray(params["w1"], jnp.float32).T                          # [in, hidden]
    b1 = jnp.asarray(params["b1"], jnp.float32).reshape(1, -1)
    w2 = jnp.asarray(params["w2"], jnp.float32).T                          # [hidden, hidden]
    b2 = jnp.asarray(params["b2"], jnp.float32).reshape(1, -1)
    wp = jnp.asarray(params["wp"], jnp.float32).T                          # [hidden, n_actions]
    bp = jnp.asarray(params["bp"], jnp.float32)
    wv = jnp.asarray(params["wv"], jnp.float32).T                          # [hidden, 1]
    bv = jnp.asarray(params["bv"], jnp.float32)

    hidden, n_actions = wp.shape
    head_pad = _round_up(n_actions + 1, LANE)                              # lane-dense output width
    wh = jnp.zeros((hidden, head_pad), jnp.float32)
    wh = wh.at[:, :n_actions].set(wp).at[:, n_actions].set(wv[:, 0])
    bh = jnp.zeros((1, head_pad), jnp.float32)
    bh = bh.at[0, :n_actions].set(bp).at[0, n_actions].set(bv[0])

    return dict(w1=w1, b1=b1, w2=w2, b2=b2, wh=wh, bh=bh,
                in_dim=int(w1.shape[0]), n_actions=int(n_actions), head_pad=int(head_pad))


@functools.partial(jax.jit, static_argnames=("n_actions", "tile_b"))
def _ppo_pallas_batched(xb, w1, b1, w2, b2, wh, bh, *, n_actions, tile_b):
    """Run the fused PPO MLP on a [B_pad, in_dim] slab, tile_b rows per grid step.
    Weights use constant index_maps so they stay VMEM-resident across grid steps."""
    b_pad, in_dim = xb.shape
    head_pad = wh.shape[1]
    grid = (b_pad // tile_b,)

    def full(shape):
        return pl.BlockSpec(shape, lambda i: (0, 0))

    return pl.pallas_call(
        _make_kernel(n_actions),
        out_shape=jax.ShapeDtypeStruct((b_pad, head_pad), jnp.float32),
        grid_spec=pltpu.PrefetchScalarGridSpec(
            num_scalar_prefetch=0,
            grid=grid,
            in_specs=[
                pl.BlockSpec((tile_b, in_dim), lambda i: (i, 0)),          # x tiles iterate
                full(w1.shape), full(b1.shape),
                full(w2.shape), full(b2.shape),
                full(wh.shape), full(bh.shape),
            ],
            out_specs=pl.BlockSpec((tile_b, head_pad), lambda i: (i, 0)),  # lane-dense store
        ),
        compiler_params=pltpu.CompilerParams(
            dimension_semantics=("parallel",)),                            # shards over v7x's 2 TCs
    )(xb, w1, b1, w2, b2, wh, bh)


def adapt_net_forward(x, prepared):
    """AdaptNet.forward: flatten, crop or zero-pad to in_dim, then run the PPO base.

    The crop/pad is static host-side shape logic (mirrors torch's numel() branch);
    the Pallas call always sees a fixed [8, in_dim] tile, so the Mosaic kernel is
    compiled exactly once per parameter layout regardless of raw observation length.
    """
    in_dim = prepared["in_dim"]
    n_actions = prepared["n_actions"]

    x = jnp.ravel(x).astype(jnp.float32)
    n = x.shape[0]
    if n > in_dim:
        x = x[:in_dim]
    elif n < in_dim:
        x = jnp.concatenate([x, jnp.zeros((in_dim - n,), jnp.float32)])

    # Single observation as row 0 of an 8-row (sublane-aligned) tile.
    xb = jnp.zeros((SUBLANE, in_dim), jnp.float32).at[0].set(x)
    out = _ppo_pallas_batched(xb, prepared["w1"], prepared["b1"], prepared["w2"],
                              prepared["b2"], prepared["wh"], prepared["bh"],
                              n_actions=n_actions, tile_b=SUBLANE)
    return out[0, :n_actions], out[0, n_actions:n_actions + 1]


def adapt_net_forward_batched(xb, prepared, *, tile_b=128):
    """Batched throughput path: each row of xb is an already cropped/padded observation
    (semantically a vmapped AdaptNet forward). tile_b=128 suits v5e; 256 also fine on
    v6e/v7x — the tiny footprint is far below every generation's VMEM limit."""
    in_dim = prepared["in_dim"]
    n_actions = prepared["n_actions"]
    b = xb.shape[0]

    tile_b = _round_up(max(1, min(tile_b, b)), SUBLANE)
    b_pad = _round_up(b, tile_b)
    xb = xb.astype(jnp.float32)
    if b_pad != b:
        xb = jnp.concatenate([xb, jnp.zeros((b_pad - b, in_dim), jnp.float32)], axis=0)

    out = _ppo_pallas_batched(xb, prepared["w1"], prepared["b1"], prepared["w2"],
                              prepared["b2"], prepared["wh"], prepared["bh"],
                              n_actions=n_actions, tile_b=tile_b)
    return out[:b, :n_actions], out[:b, n_actions:n_actions + 1]


if __name__ == "__main__":
    IN_DIM = 32        # base.fc1.in_features
    HIDDEN = 128
    N_ACTIONS = 8

    key = jax.random.PRNGKey(0)
    k_params, k_x = jax.random.split(key)
    params = init_ppo_params(k_params, IN_DIM, HIDDEN, N_ACTIONS)
    prepared = prepare_adapt_params(params)

    # Truncation branch: raw observation longer than in_dim.
    x_long = jax.random.normal(k_x, (40,), jnp.float32)
    policy, value = adapt_net_forward(x_long, prepared)
    jax.block_until_ready((policy, value))
    assert policy.shape == (N_ACTIONS,)
    assert value.shape == (1,)
    assert bool(jnp.isclose(jnp.sum(policy), 1.0, atol=1e-5))
    assert bool(jnp.all(policy >= 0.0))

    # Padding branch: raw observation shorter than in_dim.
    x_short = jax.random.normal(jax.random.PRNGKey(1), (20,), jnp.float32)
    p2, v2 = adapt_net_forward(x_short, prepared)
    jax.block_until_ready((p2, v2))
    assert bool(jnp.isclose(jnp.sum(p2), 1.0, atol=1e-5))

    # Batched throughput path (grid over batch, tile_b rows per step).
    xb = jax.random.normal(jax.random.PRNGKey(2), (16, IN_DIM), jnp.float32)
    pb, vb = adapt_net_forward_batched(xb, prepared, tile_b=8)
    jax.block_until_ready((pb, vb))
    assert pb.shape == (16, N_ACTIONS) and vb.shape == (16, 1)
    assert bool(jnp.allclose(jnp.sum(pb, axis=-1), 1.0, atol=1e-5))

    # Cross-check: batched row 0 matches a single-observation call on the same row.
    p_single, v_single = adapt_net_forward(xb[0], prepared)
    jax.block_until_ready((p_single, v_single))
    assert bool(jnp.allclose(p_single, pb[0], atol=1e-5))
    assert bool(jnp.allclose(v_single, vb[0], atol=1e-5))

    print("KERNEL_OK")
</pallas_src>

<mosaic_0001>
module attributes {stable_mosaic.version = 11 : i64} {
  func.func @kernel(%arg0: i32, %arg1: memref<8x32xf32, #tpu.memory_space<vmem>>, %arg2: memref<32x128xf32, #tpu.memory_space<vmem>>, %arg3: memref<1x128xf32, #tpu.memory_space<vmem>>, %arg4: memref<128x128xf32, #tpu.memory_space<vmem>>, %arg5: memref<1x128xf32, #tpu.memory_space<vmem>>, %arg6: memref<128x128xf32, #tpu.memory_space<vmem>>, %arg7: memref<1x128xf32, #tpu.memory_space<vmem>>, %arg8: memref<8x128xf32, #tpu.memory_space<vmem>>) attributes {dimension_semantics = [#tpu.dimension_semantics<parallel>], iteration_bounds = array<i64: 1>, scalar_prefetch = 0 : i64, scratch_operands = 0 : i64, tpu.core_type = #tpu.core_type<tc>, window_params = [{transform_indices = @transform_0, window_bounds = array<i64: 8, 32>}, {pipeline_mode = #tpu.pipeline_mode<synchronous>, transform_indices = @transform_1, window_bounds = array<i64: 32, 128>}, {pipeline_mode = #tpu.pipeline_mode<synchronous>, transform_indices = @transform_2, window_bounds = array<i64: 1, 128>}, {pipeline_mode = #tpu.pipeline_mode<synchronous>, transform_indices = @transform_3, window_bounds = array<i64: 128, 128>}, {pipeline_mode = #tpu.pipeline_mode<synchronous>, transform_indices = @transform_4, window_bounds = array<i64: 1, 128>}, {pipeline_mode = #tpu.pipeline_mode<synchronous>, transform_indices = @transform_5, window_bounds = array<i64: 128, 128>}, {pipeline_mode = #tpu.pipeline_mode<synchronous>, transform_indices = @transform_6, window_bounds = array<i64: 1, 128>}, {transform_indices = @transform_7, window_bounds = array<i64: 8, 128>}]} {
    %c0 = arith.constant 0 : index
    %c0_0 = arith.constant 0 : index
    %0 = vector.load %arg1[%c0, %c0_0] : memref<8x32xf32, #tpu.memory_space<vmem>>, vector<8x32xf32>
    %c0_1 = arith.constant 0 : index
    %c0_2 = arith.constant 0 : index
    %1 = vector.load %arg2[%c0_1, %c0_2] : memref<32x128xf32, #tpu.memory_space<vmem>>, vector<32x128xf32>
    %cst = arith.constant dense<0.000000e+00> : vector<8x128xf32>
    %2 = tpu.matmul %0, %1, %cst {dimension_numbers = #tpu.dot_dimension_numbers<[1], [0], [0], [1], [0, 0, 1, 1], [], []>} : vector<8x32xf32>, vector<32x128xf32>, vector<8x128xf32> -> vector<8x128xf32>
    %c0_3 = arith.constant 0 : index
    %c0_4 = arith.constant 0 : index
    %3 = vector.load %arg3[%c0_3, %c0_4] : memref<1x128xf32, #tpu.memory_space<vmem>>, vector<1x128xf32>
    %4 = vector.broadcast %3 : vector<1x128xf32> to vector<8x128xf32>
    %5 = arith.addf %2, %4 : vector<8x128xf32>
    %cst_5 = arith.constant 0.000000e+00 : f32
    %6 = vector.broadcast %cst_5 : f32 to vector<8x128xf32>
    %7 = arith.maximumf %5, %6 : vector<8x128xf32>
    %c0_6 = arith.constant 0 : index
    %c0_7 = arith.constant 0 : index
    %8 = vector.load %arg4[%c0_6, %c0_7] : memref<128x128xf32, #tpu.memory_space<vmem>>, vector<128x128xf32>
    %cst_8 = arith.constant dense<0.000000e+00> : vector<8x128xf32>
    %9 = tpu.matmul %7, %8, %cst_8 {dimension_numbers = #tpu.dot_dimension_numbers<[1], [0], [0], [1], [0, 0, 1, 1], [], []>} : vector<8x128xf32>, vector<128x128xf32>, vector<8x128xf32> -> vector<8x128xf32>
    %c0_9 = arith.constant 0 : index
    %c0_10 = arith.constant 0 : index
    %10 = vector.load %arg5[%c0_9, %c0_10] : memref<1x128xf32, #tpu.memory_space<vmem>>, vector<1x128xf32>
    %11 = vector.broadcast %10 : vector<1x128xf32> to vector<8x128xf32>
    %12 = arith.addf %9, %11 : vector<8x128xf32>
    %cst_11 = arith.constant 0.000000e+00 : f32
    %13 = vector.broadcast %cst_11 : f32 to vector<8x128xf32>
    %14 = arith.maximumf %12, %13 : vector<8x128xf32>
    %c0_12 = arith.constant 0 : index
    %c0_13 = arith.constant 0 : index
    %15 = vector.load %arg6[%c0_12, %c0_13] : memref<128x128xf32, #tpu.memory_space<vmem>>, vector<128x128xf32>
    %cst_14 = arith.constant dense<0.000000e+00> : vector<8x128xf32>
    %16 = tpu.matmul %14, %15, %cst_14 {dimension_numbers = #tpu.dot_dimension_numbers<[1], [0], [0], [1], [0, 0, 1, 1], [], []>} : vector<8x128xf32>, vector<128x128xf32>, vector<8x128xf32> -> vector<8x128xf32>
    %c0_15 = arith.constant 0 : index
    %c0_16 = arith.constant 0 : index
    %17 = vector.load %arg7[%c0_15, %c0_16] : memref<1x128xf32, #tpu.memory_space<vmem>>, vector<1x128xf32>
    %18 = vector.broadcast %17 : vector<1x128xf32> to vector<8x128xf32>
    %19 = arith.addf %16, %18 : vector<8x128xf32>
    %20 = tpu.iota {dimensions = array<i32: 1>} : vector<8x128xi32>
    %c8_i32 = arith.constant 8 : i32
    %21 = vector.broadcast %c8_i32 : i32 to vector<8x128xi32>
    %22 = arith.cmpi slt, %20, %21 : vector<8x128xi32>
    %cst_17 = arith.constant 0xFF800000 : f32
    %23 = vector.broadcast %cst_17 : f32 to vector<8x128xf32>
    %24 = arith.select %22, %19, %23 : vector<8x128xi1>, vector<8x128xf32>
    %cst_18 = arith.constant dense<0xFF800000> : vector<8xf32>
    %25 = vector.multi_reduction <maximumf>, %24, %cst_18 [1] : vector<8x128xf32> to vector<8xf32>
    %26 = vector.shape_cast %25 : vector<8xf32> to vector<8x1xf32>
    %27 = vector.broadcast %26 : vector<8x1xf32> to vector<8x128xf32>
    %28 = arith.subf %24, %27 : vector<8x128xf32>
    %29 = math.exp %28 : vector<8x128xf32>
    %cst_19 = arith.constant dense<0.000000e+00> : vector<8xf32>
    %30 = vector.multi_reduction <add>, %29, %cst_19 [1] : vector<8x128xf32> to vector<8xf32>
    %31 = vector.shape_cast %30 : vector<8xf32> to vector<8x1xf32>
    %32 = vector.broadcast %31 : vector<8x1xf32> to vector<8x128xf32>
    %33 = arith.divf %29, %32 : vector<8x128xf32>
    %34 = arith.select %22, %33, %19 : vector<8x128xi1>, vector<8x128xf32>
    %c0_20 = arith.constant 0 : index
    %c0_21 = arith.constant 0 : index
    %35 = vector.load %arg8[%c0_20, %c0_21] : memref<8x128xf32, #tpu.memory_space<vmem>>, vector<8x128xf32>
    tpu.vector_store %arg8[%c0_20, %c0_21], %34 {strides = array<i32>} : memref<8x128xf32, #tpu.memory_space<vmem>>, vector<8x128xf32>,
    return
  }
  func.func @transform_0(%arg0: i32) -> (i32, i32) {
    %c0_i32 = arith.constant 0 : i32
    %c0_i32_0 = arith.constant 0 : i32
    return %arg0, %c0_i32 : i32, i32
  }
  func.func @transform_1(%arg0: i32) -> (i32, i32) {
    %c0_i32 = arith.constant 0 : i32
    %c0_i32_0 = arith.constant 0 : i32
    %c0_i32_1 = arith.constant 0 : i32
    return %c0_i32, %c0_i32_0 : i32, i32
  }
  func.func @transform_2(%arg0: i32) -> (i32, i32) {
    %c0_i32 = arith.constant 0 : i32
    %c0_i32_0 = arith.constant 0 : i32
    %c0_i32_1 = arith.constant 0 : i32
    return %c0_i32, %c0_i32_0 : i32, i32
  }
  func.func @transform_3(%arg0: i32) -> (i32, i32) {
    %c0_i32 = arith.constant 0 : i32
    %c0_i32_0 = arith.constant 0 : i32
    %c0_i32_1 = arith.constant 0 : i32
    return %c0_i32, %c0_i32_0 : i32, i32
  }
  func.func @transform_4(%arg0: i32) -> (i32, i32) {
    %c0_i32 = arith.constant 0 : i32
    %c0_i32_0 = arith.constant 0 : i32
    %c0_i32_1 = arith.constant 0 : i32
    return %c0_i32, %c0_i32_0 : i32, i32
  }
  func.func @transform_5(%arg0: i32) -> (i32, i32) {
    %c0_i32 = arith.constant 0 : i32
    %c0_i32_0 = arith.constant 0 : i32
    %c0_i32_1 = arith.constant 0 : i32
    return %c0_i32, %c0_i32_0 : i32, i32
  }
  func.func @transform_6(%arg0: i32) -> (i32, i32) {
    %c0_i32 = arith.constant 0 : i32
    %c0_i32_0 = arith.constant 0 : i32
    %c0_i32_1 = arith.constant 0 : i32
    return %c0_i32, %c0_i32_0 : i32, i32
  }
  func.func @transform_7(%arg0: i32) -> (i32, i32) {
    %c0_i32 = arith.constant 0 : i32
    %c0_i32_0 = arith.constant 0 : i32
    return %arg0, %c0_i32 : i32, i32
  }
}

</mosaic_0001>

<bundles_post_ra>
// kernel: _ppo_pallas_batched.1
= control target key start
LH: loop header
LB: loop body
LE: loop exit
PB: predicated region body
PF: predicated region fallthrough
CT: control target
= control target key end

     0   :  { %12 = vsyncpa [#allocation3], 0  ;;  %s847_s0 = inlined_call_operand.hbm [shape: f32[8,32], index: 0, kind: input, shape index: {}]   ;;  %s848_s1 = inlined_call_operand.hbm [shape: f32[32,128], index: 1, kind: input, shape index: {}]   ;;  %s849_s2 = inlined_call_operand.vmem [shape: f32[1,128], index: 2, kind: input, shape index: {}]   ;;  %s850_s3 = inlined_call_operand.hbm [shape: f32[128,128], index: 3, kind: input, shape index: {}]   ;;  %s851_s4 = inlined_call_operand.vmem [shape: f32[1,128], index: 4, kind: input, shape index: {}]   ;;  %s852_s5 = inlined_call_operand.hbm [shape: f32[128,128], index: 5, kind: input, shape index: {}]   ;;  %s853_s6 = inlined_call_operand.vmem [shape: f32[1,128], index: 6, kind: input, shape index: {}]   ;;  %s854_s7 = inlined_call_operand.hbm [shape: f32[8,128], index: 7, kind: output, shape index: {}]  }
   0x1   :  { %13 = vsyncpa [#allocation6], 0 }
   0x2   :  { %14 = vsyncpa [#allocation9], 0 }
   0x3   :  { %15 = vsyncpa [#allocation4], 0  ;;  %s696_s24 = smov [#allocation5]   ;;  %s578_s28 = scalar_lea.hbm %s848_s1, 512 }
   0x4   :  { %s31_s25 = sshll.u32 %s696_s24, 4  ;;  %p579_p0 = scmp.ne.s32.totalorder %s848_s1, %s578_s28  ;;  %s32_s25 = int_to_ptr.vmem [resolvable:$true] %s31_s25 }
   0x5   :  { %p582_p1 = scmp.lt.u32.totalorder %s578_s28, %s848_s1 }
   0x7   :  { %p584_p2 = pnand %p582_p1, %p579_p0 }
   0x9   :  { %587 = shalt.err (!%p584_p2)
}
   0xa   :  { %s588_s10 = scalar_lea.vmem %s32_s25, 512  ;;  %p593_p4 = scmp.lt.s32.totalorder %s32_s25, %s32_s25 }
   0xb   :  { %p589_p3 = scmp.ne.s32.totalorder %s32_s25, %s588_s10  ;;  %p594_p5 = scmp.lt.s32.totalorder %s588_s10, %s588_s10 }
   0xd   :  { %p595_p6 = por %p594_p5, %p593_p4 }
   0xf   :  { %p596_p7 = pnand %p595_p6, %p589_p3 }
  0x11   :  { %599 = shalt.err (!%p596_p7)
}
  0x12   :  { %s697_s11 = smov 128   ;;  %s698_s12 = smov 8  }
  0x13   :  { %37 = dma.hbm_to_vmem [thread:$0]  %s848_s1, 512, %s32_s25, [#allocation6], %s697_s11, %s697_s11, %s698_s12  }
  0x14   :  { %s699_s15 = smov [#allocation2]   ;;  %s700_s17 = smov [#allocation7]  }
  0x15   :  { %s22_s16 = sshll.u32 %s699_s15, 4  ;;  %s45_s18 = sshll.u32 %s700_s17, 4  ;;  %s23_s16 = int_to_ptr.vmem [resolvable:$true] %s22_s16  ;;  %s46_s18 = int_to_ptr.vmem [resolvable:$true] %s45_s18 }
  0x16   :  { %s600_s21 = scalar_lea.hbm %s847_s0, 128 }
  0x17   :  { %p601_p8 = scmp.ne.s32.totalorder %s847_s0, %s600_s21  ;;  %p604_p9 = scmp.lt.u32.totalorder %s600_s21, %s847_s0 }
  0x19   :  { %p606_p10 = pnand %p604_p9, %p601_p8 }
  0x1b   :  { %609 = shalt.err (!%p606_p10)
}
  0x1c   :  { %s610_s1 = scalar_lea.vmem %s23_s16, 128  ;;  %p615_p12 = scmp.lt.s32.totalorder %s23_s16, %s23_s16 }
  0x1d   :  { %p611_p11 = scmp.ne.s32.totalorder %s23_s16, %s610_s1  ;;  %p616_p13 = scmp.lt.s32.totalorder %s610_s1, %s610_s1 }
  0x1f   :  { %p617_p0 = por %p616_p13, %p615_p12 }
  0x21   :  { %p618_p1 = pnand %p617_p0, %p611_p11 }
  0x23   :  { %621 = shalt.err (!%p618_p1)
}
  0x24   :  { %25 = dma.hbm_to_vmem [thread:$0]  %s847_s0, 128, %s23_s16, [#allocation3]  }
  0x25   :  { %s622_s30 = scalar_lea.hbm %s850_s3, 2048 }
  0x26   :  { %p623_p2 = scmp.ne.s32.totalorder %s850_s3, %s622_s30  ;;  %p626_p3 = scmp.lt.u32.totalorder %s622_s30, %s850_s3 }
  0x28   :  { %p628_p4 = pnand %p626_p3, %p623_p2 }
  0x2a   :  { %631 = shalt.err (!%p628_p4)
}
  0x2b   :  { %s632_s14 = scalar_lea.vmem %s46_s18, 2048  ;;  %p637_p6 = scmp.lt.s32.totalorder %s46_s18, %s46_s18 }
  0x2c   :  { %p633_p5 = scmp.ne.s32.totalorder %s46_s18, %s632_s14  ;;  %p638_p7 = scmp.lt.s32.totalorder %s632_s14, %s632_s14 }
  0x2e   :  { %p639_p8 = por %p638_p7, %p637_p6 }
  0x30   :  { %p640_p9 = pnand %p639_p8, %p633_p5 }
  0x32   :  { %643 = shalt.err (!%p640_p9)
}
  0x33   :  { %51 = dma.hbm_to_vmem [thread:$0]  %s850_s3, 2048, %s46_s18, [#allocation6], %s697_s11, %s697_s11, %s698_s12  }
  0x34   :  { %s701_s16 = smov [#allocation8]   ;;  %s644_s21 = scalar_lea.hbm %s852_s5, 2048 }
  0x35   :  { %s59_s17 = sshll.u32 %s701_s16, 4  ;;  %p645_p10 = scmp.ne.s32.totalorder %s852_s5, %s644_s21  ;;  %s60_s17 = int_to_ptr.vmem [resolvable:$true] %s59_s17 }
  0x36   :  { %p648_p11 = scmp.lt.u32.totalorder %s644_s21, %s852_s5 }
  0x38   :  { %p650_p12 = pnand %p648_p11, %p645_p10 }
  0x3a   :  { %653 = shalt.err (!%p650_p12)
}
  0x3b   :  { %s654_s1 = scalar_lea.vmem %s60_s17, 2048  ;;  %p659_p0 = scmp.lt.s32.totalorder %s60_s17, %s60_s17 }
  0x3c   :  { %p655_p13 = scmp.ne.s32.totalorder %s60_s17, %s654_s1  ;;  %p660_p1 = scmp.lt.s32.totalorder %s654_s1, %s654_s1 }
  0x3e   :  { %p661_p2 = por %p660_p1, %p659_p0 }
  0x40   :  { %p662_p3 = pnand %p661_p2, %p655_p13 }
  0x42   :  { %665 = shalt.err (!%p662_p3)
}
  0x43   :  { %65 = dma.hbm_to_vmem [thread:$0]  %s852_s5, 2048, %s60_s17, [#allocation9], %s697_s11, %s697_s11, %s698_s12  }
  0x44   :  { %688 = dma.done.wait [#allocation3], 128  }
  0x45   :  { %689 = vsyncadd [#allocation3], 4294967168 }
  0x46   :  { %690 = dma.done.wait [#allocation6], 2560  }
  0x47   :  { %691 = vsyncadd [#allocation6], 4294964736 }
  0x48   :  { %692 = dma.done.wait [#allocation9], 2048  }
  0x49   :  { %693 = vsyncadd [#allocation9], 4294965248  ;;  %v702_v0 = vmov 0.0|0.0   ;;  %vm703_vm0 = vmmov 0   ;;  %v704_v1 = vmov 0.0   ;;  %v81_v2 = vld [vmem:[#allocation5] sm:$0xff] }
  0x4a   :  { %510 = vmatprep.subr.bf16.mxu0 %v702_v0  ;;  %437 = vmatprep.mubr.msk.f32.mxu0 %vm703_vm0, %v704_v1  ;;  %v82_v3 = vld [vmem:[#allocation5 + $0x8] sm:$0xff]  ;;  %v83_v4 = vld [vmem:[#allocation5 + $0x10] sm:$0xff]  ;;  %v84_v6 = vld [vmem:[#allocation5 + $0x18] sm:$0xff]  ;;  %vm92_vm1 = vcmask 261120  }
  0x4b   :  { %516 = vmatprep.subr.bf16.mxu1 %v702_v0  ;;  %472 = vmatprep.mubr.msk.f32.mxu1 %vm703_vm0, %v704_v1  ;;  %v511_v5 = vpack.c.bf16 %v82_v3, %v81_v2  ;;  %v167_v7 = vld [vmem:[#allocation7] sm:$0xff]  ;;  %v168_v8 = vld [vmem:[#allocation7 + $0x8] sm:$0xff]  ;;  %v169_v9 = vld [vmem:[#allocation7 + $0x10] sm:$0xff]  ;;  %v514_v11 = vpack.c.bf16 %v84_v6, %v83_v4  ;;  %v354_v3 = vlaneseq }
  0x4c   :  { %v170_v10 = vld [vmem:[#allocation7 + $0x18] sm:$0xff]  ;;  %v517_v12 = vpack.c.bf16 %v168_v8, %v167_v7  ;;  %v171_v14 = vld [vmem:[#allocation7 + $0x20] sm:$0xff]  ;;  %v172_v15 = vld [vmem:[#allocation7 + $0x28] sm:$0xff] }
  0x4d   :  { %512 = vmatpush3.bf16.msra.mxu0 %v511_v5  ;;  %v520_v13 = vpack.c.bf16 %v170_v10, %v169_v9  ;;  %v80_v16 = vld [vmem:[#allocation2] sm:$0xff]  ;;  %v523_v17 = vpack.c.bf16 %v172_v15, %v171_v14  ;;  %v173_v18 = vld [vmem:[#allocation7 + $0x30] sm:$0xff]  ;;  %v175_v21 = vld [vmem:[#allocation7 + $0x40] sm:$0xff]  ;;  %v355_v4 = vand.u32 127, %v354_v3 }
  0x4e   :  { %513 = vmatprep.subr.bf16.mxu0 %v702_v0  ;;  %518 = vmatpush3.bf16.msra.mxu1 %v517_v12  ;;  %v174_v19 = vld [vmem:[#allocation7 + $0x38] sm:$0xff]  ;;  %v176_v22 = vld [vmem:[#allocation7 + $0x48] sm:$0xff]  ;;  %v177_v24 = vld [vmem:[#allocation7 + $0x50] sm:$0xff] }
  0x4f   :  { %519 = vmatprep.subr.bf16.mxu1 %v702_v0  ;;  %v526_v20 = vpack.c.bf16 %v174_v19, %v173_v18  ;;  %v529_v23 = vpack.c.bf16 %v176_v22, %v175_v21  ;;  %v178_v25 = vld [vmem:[#allocation7 + $0x58] sm:$0xff]  ;;  %v179_v27 = vld [vmem:[#allocation7 + $0x60] sm:$0xff]  ;;  %v180_v28 = vld [vmem:[#allocation7 + $0x68] sm:$0xff]  ;;  %vm356_vm2 = vcmp.lt.s32.totalorder %v355_v4, 8 }
  0x50   :  { %v532_v26 = vpack.c.bf16 %v178_v25, %v177_v24  ;;  %v535_v29 = vpack.c.bf16 %v180_v28, %v179_v27  ;;  %v181_v30 = vld [vmem:[#allocation7 + $0x70] sm:$0xff]  ;;  %v182_v31 = vld [vmem:[#allocation7 + $0x78] sm:$0xff]  ;;  %v261_v33 = vld [vmem:[#allocation8] sm:$0xff] }
  0x51   :  { %515 = vmatpush3.bf16.msra.mxu0 %v514_v11  ;;  %v538_v32 = vpack.c.bf16 %v182_v31, %v181_v30  ;;  %v262_v34 = vld [vmem:[#allocation8 + $0x8] sm:$0xff]  ;;  %v263_v35 = vld [vmem:[#allocation8 + $0x10] sm:$0xff]  ;;  %v264_v37 = vld [vmem:[#allocation8 + $0x18] sm:$0xff] }
  0x52   :  { %540 = vmatprep.subr.bf16.mxu0 %v702_v0  ;;  %521 = vmatpush3.bf16.msra.mxu1 %v520_v13  ;;  %v541_v36 = vpack.c.bf16 %v262_v34, %v261_v33  ;;  %v544_v38 = vpack.c.bf16 %v264_v37, %v263_v35  ;;  %v265_v39 = vld [vmem:[#allocation8 + $0x20] sm:$0xff]  ;;  %v266_v40 = vld [vmem:[#allocation8 + $0x28] sm:$0xff]  ;;  %v267_v42 = vld [vmem:[#allocation8 + $0x30] sm:$0xff] }
  0x53   :  { %522 = vmatprep.subr.bf16.mxu1 %v702_v0  ;;  %v547_v41 = vpack.c.bf16 %v266_v40, %v265_v39  ;;  %v268_v43 = vld [vmem:[#allocation8 + $0x38] sm:$0xff]  ;;  %v269_v45 = vld [vmem:[#allocation8 + $0x40] sm:$0xff]  ;;  %v270_v46 = vld [vmem:[#allocation8 + $0x48] sm:$0xff] }
  0x54   :  { %438 = vmatmul.mubr.msk.f32.vlgmr.msra.gmra.mrb[0].mxu0 %vm92_vm1, %v80_v16  ;;  %v550_v44 = vpack.c.bf16 %v268_v43, %v267_v42  ;;  %v553_v47 = vpack.c.bf16 %v270_v46, %v269_v45  ;;  %v271_v48 = vld [vmem:[#allocation8 + $0x50] sm:$0xff]  ;;  %v272_v49 = vld [vmem:[#allocation8 + $0x58] sm:$0xff]  ;;  %v273_v51 = vld [vmem:[#allocation8 + $0x60] sm:$0xff] }
  0x55   :  { %507 = vmatprep.mubr.msk.f32.mxu0 %vm703_vm0, %v704_v1  ;;  %542 = vmatpush3.bf16.msra.mxu0 %v541_v36  ;;  %v556_v50 = vpack.c.bf16 %v272_v49, %v271_v48  ;;  %v274_v52 = vld [vmem:[#allocation8 + $0x68] sm:$0xff]  ;;  %v386_v54 = vld [vmem:[%s849_s2] ss:$0 sm:$0xff]  ;;  %v275_v59 = vld [vmem:[#allocation8 + $0x70] sm:$0xff] }
  0x56   :  { %524 = vmatpush3.bf16.msra.mxu1 %v523_v17  ;;  %543 = vmatprep.subr.bf16.mxu0 %v702_v0  ;;  %v559_v53 = vpack.c.bf16 %v274_v52, %v273_v51  ;;  %v276_v60 = vld [vmem:[#allocation8 + $0x78] sm:$0xff] }
  0x57   :  { %525 = vmatprep.subr.bf16.mxu1 %v702_v0  ;;  %v562_v61 = vpack.c.bf16 %v276_v60, %v275_v59  ;;  %v388_v62 = vld [vmem:[%s851_s4] ss:$0 sm:$0xff]  ;;  %s705_s4 = smov [#allocation10]  }
  0x58   :  { %v389_v5 = vld [vmem:[%s853_s6] ss:$0 sm:$0xff]  ;;  %s375_s28 = sshll.u32 %s705_s4, 4  ;;  %s376_s28 = int_to_ptr.vmem [resolvable:$true] %s375_s28 }
  0x59   :  { %545 = vmatpush3.bf16.msra.mxu0 %v544_v38  ;;  %s666_s6 = scalar_lea.vmem %s376_s28, 128  ;;  %p671_p5 = scmp.lt.s32.totalorder %s376_s28, %s376_s28 }
  0x5a   :  { %527 = vmatpush3.bf16.msra.mxu1 %v526_v20  ;;  %546 = vmatprep.subr.bf16.mxu0 %v702_v0  ;;  %p667_p4 = scmp.ne.s32.totalorder %s376_s28, %s666_s6  ;;  %p672_p6 = scmp.lt.s32.totalorder %s666_s6, %s666_s6 }
  0x5b   :  { %528 = vmatprep.subr.bf16.mxu1 %v702_v0 }
  0x5c   :  { %p673_p7 = por %p672_p6, %p671_p5 }
  0x5d   :  { %548 = vmatpush3.bf16.msra.mxu0 %v547_v41 }
  0x5e   :  { %530 = vmatpush3.bf16.msra.mxu1 %v529_v23  ;;  %549 = vmatprep.subr.bf16.mxu0 %v702_v0  ;;  %p674_p8 = pnand %p673_p7, %p667_p4 }
  0x5f   :  { %531 = vmatprep.subr.bf16.mxu1 %v702_v0 }
  0x61   :  { %551 = vmatpush3.bf16.msra.mxu0 %v550_v44 }
  0x62   :  { %533 = vmatpush3.bf16.msra.mxu1 %v532_v26  ;;  %552 = vmatprep.subr.bf16.mxu0 %v702_v0 }
  0x63   :  { %534 = vmatprep.subr.bf16.mxu1 %v702_v0 }
  0x65   :  { %554 = vmatpush3.bf16.msra.mxu0 %v553_v47 }
  0x66   :  { %536 = vmatpush3.bf16.msra.mxu1 %v535_v29  ;;  %555 = vmatprep.subr.bf16.mxu0 %v702_v0 }
  0x67   :  { %537 = vmatprep.subr.bf16.mxu1 %v702_v0 }
  0x69   :  { %557 = vmatpush3.bf16.msra.mxu0 %v556_v50 }
  0x6a   :  { %539 = vmatpush3.bf16.msra.mxu1 %v538_v32  ;;  %558 = vmatprep.subr.bf16.mxu0 %v702_v0 }
  0x6d   :  { %560 = vmatpush3.bf16.msra.mxu0 %v559_v53 }
  0x6e   :  { %561 = vmatprep.subr.bf16.mxu0 %v702_v0 }
  0x71   :  { %563 = vmatpush3.bf16.msra.mxu0 %v562_v61 }
 0x127   :  { %v162_v55 = vpop.f32.mrb[0].mxu0 }
 0x128   :  { %v163_v56 = vadd.f32 %v386_v54, %v162_v55  ;;  %v439_v57 = vpop.f32.mrb[1].mxu0 }
 0x12a   :  { %v166_v58 = vmax.f32 %v163_v56, 0.0 }
 0x12c   :  { %473 = vmatmul.mubr.f32.vlgmr.msra.gmra.mrb[0].mxu1 %v166_v58 }
 0x1ff   :  { %v256_v63 = vpop.f32.mrb[0].mxu1 }
 0x200   :  { %v257_v1 = vadd.f32 %v388_v62, %v256_v63  ;;  %v474_v0 = vpop.f32.mrb[1].mxu1 }
 0x202   :  { %v260_v2 = vmax.f32 %v257_v1, 0.0 }
 0x204   :  { %508 = vmatmul.mubr.f32.vlgmr.msra.gmra.mrb[2].mxu0 %v260_v2 }
 0x2d7   :  { %v350_v6 = vpop.f32.mrb[2].mxu0 }
 0x2d8   :  { %v351_v7 = vadd.f32 %v389_v5, %v350_v6  ;;  %v509_v8 = vpop.f32.mrb[3].mxu0 }
 0x2da   :  { %v357_v9 = vsel %vm356_vm2, %v351_v7, -inf }
 0x2db   :  { %358 = vmax.xlane.f32.xlu0 %v357_v9 }
 0x368   :  { %v359_v10 = vpop.xlane.xlu0 %358 }
 0x369   :  { %v360_v11 = vsub.f32 %v357_v9, %v359_v10 }
 0x36b   :  { %v361_v12 = vmul.f32 1.442695, %v360_v11 }
 0x36d   :  { %574 = vpow2.f32 %v361_v12 }
 0x377   :  { %v575_v13 = vpop.eup %574 }
 0x378   :  { %363 = vadd.xlane.f32.xlu0 %v575_v13 }
 0x405   :  { %v364_v14 = vpop.xlane.xlu0 %363 }
 0x406   :  { %576 = vrcp.f32 %v364_v14 }
 0x410   :  { %v577_v15 = vpop.eup %576 }
 0x411   :  { %v366_v16 = vmul.f32 %v577_v15, %v575_v13 }
 0x413   :  { %v367_v17 = vsel %vm356_vm2, %v366_v16, %v351_v7 }
 0x414   :  { %368 = vst [vmem:[#allocation10] sm:$0xff] %v367_v17 }
 0x415   :  { %677 = shalt.err (!%p674_p8)
}
 0x416   :  { %s678_s8 = scalar_lea.hbm %s854_s7, 128 }
 0x417   :  { %p679_p9 = scmp.ne.s32.totalorder %s854_s7, %s678_s8  ;;  %p682_p10 = scmp.lt.u32.totalorder %s678_s8, %s854_s7 }
 0x419   :  { %p684_p11 = pnand %p682_p10, %p679_p9 }
 0x41b   :  { %687 = shalt.err (!%p684_p11)
}
 0x41c   :  { %378 = dma.vmem_to_hbm [thread:$0]  %s376_s28, 128, %s854_s7, [#allocation4]  }
 0x41d   :  { %694 = dma.done.wait [#allocation4], 128  }
 0x41e   :  { %695 = vsyncadd [#allocation4], 4294967168 }
 0x41f   :  { %382 = vsyncpa [#allocation3], 1 }
 0x420   :  { %383 = vsyncpa [#allocation6], 1 }
 0x421   :  { %384 = vsyncpa [#allocation9], 1 }
 0x422   :  { %385 = vsyncpa [#allocation4], 1 }

</bundles_post_ra>
